<compile_context>
chip_gen: v5e
topology: v5e:2x2
jax: 0.10.0
libtpu: 0.0.40
codegen_flags: <defaults>
</compile_context>

<pallas_src>
import jax
import jax.numpy as jnp
from jax.experimental import pallas as pl
from jax.experimental.pallas import tpu as pltpu


# ----------------------------------------------------------------------------
# Kernel
# ----------------------------------------------------------------------------
def _mlp_kernel(x_ref, *refs):
    """refs = (w0, b0, w1, b1, ..., w_{L-1}, b_{L-1}, out_ref)."""
    out_ref = refs[-1]
    wb = refs[:-1]
    num_layers = len(wb) // 2

    h = x_ref[...]
    for i in range(num_layers):
        w = wb[2 * i][...]          # (d_in_pad, d_out_pad), stored dtype
        b = wb[2 * i + 1][...]      # (1, d_out_pad)
        if h.dtype != w.dtype:
            # Feed the MXU in the weights' dtype (keeps the bf16 path fast);
            # accumulation below is always f32.
            h = h.astype(w.dtype)
        h = jnp.dot(h, w, preferred_element_type=jnp.float32)
        h = h + b.astype(jnp.float32)            # f32 epilogue
        if i < num_layers - 1:                   # ReLU on all but last layer
            h = jnp.maximum(h, 0.0)
    out_ref[...] = h.astype(out_ref.dtype)


# ----------------------------------------------------------------------------
# Wrapper
# ----------------------------------------------------------------------------
def _round_up(v, n):
    return ((v + n - 1) // n) * n


_BUFFERED = getattr(pl, "Buffered", None)


def _const_spec(shape):
    """BlockSpec for a grid-invariant (weight/bias) block, single-buffered."""
    if _BUFFERED is not None:
        try:
            return pl.BlockSpec(shape, lambda i: (0, 0),
                                pipeline_mode=_BUFFERED(1))
        except TypeError:
            pass
    return pl.BlockSpec(shape, lambda i: (0, 0))


def mlp_forward(x, weights, biases, *, tile_m=512, lane=128):
    """x: (..., input_dim); weights[i]: (d_in_i, d_out_i); biases[i]: (d_out_i,)."""
    orig_shape = x.shape
    input_dim = orig_shape[-1]
    output_dim = weights[-1].shape[1]
    m = 1
    for d in orig_shape[:-1]:
        m *= d
    x2d = x.reshape(m, input_dim)

    # ---- lane-dense padding of feature dims (multiples of 128) -------------
    dims = [input_dim] + [w.shape[1] for w in weights]
    dims_pad = [_round_up(d, lane) for d in dims]

    x_p = x2d
    if dims_pad[0] != input_dim:
        x_p = jnp.pad(x2d, ((0, 0), (0, dims_pad[0] - input_dim)))

    w_p, b_p = [], []
    for i, (w, b) in enumerate(zip(weights, biases)):
        d_in, d_out = w.shape
        pi, po = dims_pad[i], dims_pad[i + 1]
        w_p.append(jnp.pad(w, ((0, pi - d_in), (0, po - d_out))))
        b_p.append(jnp.pad(b.reshape(1, d_out), ((0, 0), (0, po - d_out))))

    # ---- row-tile selection under a v7x-safe VMEM budget --------------------
    x_bytes = x.dtype.itemsize
    const_bytes = sum(int(a.size) * a.dtype.itemsize for a in (w_p + b_p))

    def vmem_needed(t):
        return (2 * t * dims_pad[0] * x_bytes        # double-buffered input tile
                + 2 * t * dims_pad[-1] * x_bytes     # double-buffered output tile
                + 4 * t * max(dims_pad)              # f32 intermediate activation
                + const_bytes)                       # resident weights/biases

    budget = 48 * 1024 * 1024                        # headroom under v7x's 64 MiB
    tile = _round_up(min(tile_m, max(8, _round_up(m, 8))), 8)
    while tile > 64 and vmem_needed(tile) > budget:
        tile = _round_up(tile // 2, 8)
    # Keep >= 2 grid steps when there is enough work (v7x has 2 TensorCores).
    if m >= 256 and _round_up(m, tile) // tile < 2:
        tile = max(8, _round_up((m + 1) // 2, 8))

    m_pad = _round_up(m, tile)
    if m_pad != m:
        x_p = jnp.pad(x_p, ((0, m_pad - m), (0, 0)))

    grid = (m_pad // tile,)
    vmem_limit = int(min(max(vmem_needed(tile) + (4 << 20), 32 << 20), 64 << 20))

    # ---- specs --------------------------------------------------------------
    in_specs = [pl.BlockSpec((tile, dims_pad[0]), lambda i: (i, 0))]
    flat_params = []
    for i in range(len(w_p)):
        pi, po = dims_pad[i], dims_pad[i + 1]
        in_specs.append(_const_spec((pi, po)))
        in_specs.append(_const_spec((1, po)))
        flat_params.append(w_p[i])
        flat_params.append(b_p[i])

    out_spec = pl.BlockSpec((tile, dims_pad[-1]), lambda i: (i, 0))

    out = pl.pallas_call(
        _mlp_kernel,
        out_shape=jax.ShapeDtypeStruct((m_pad, dims_pad[-1]), x.dtype),
        grid=grid,
        in_specs=in_specs,
        out_specs=out_spec,
        compiler_params=pltpu.CompilerParams(
            dimension_semantics=("parallel",),
            vmem_limit_bytes=vmem_limit),
    )(x_p, *flat_params)

    out = out[:m, :output_dim]
    return out.reshape(*orig_shape[:-1], output_dim)


# ----------------------------------------------------------------------------
# Params init (matches nn.Linear default init; weights stored as (in, out))
# ----------------------------------------------------------------------------
def init_mlp_params(key, input_dim, hidden_dim, output_dim, num_layers):
    h = [hidden_dim] * (num_layers - 1)
    dims_in = [input_dim] + h
    dims_out = h + [output_dim]
    weights, biases = [], []
    for d_in, d_out in zip(dims_in, dims_out):
        key, kw, kb = jax.random.split(key, 3)
        bound = 1.0 / jnp.sqrt(d_in)
        weights.append(jax.random.uniform(kw, (d_in, d_out), jnp.float32,
                                          minval=-bound, maxval=bound))
        biases.append(jax.random.uniform(kb, (d_out,), jnp.float32,
                                         minval=-bound, maxval=bound))
    return weights, biases


def mlp_reference(x, weights, biases):
    h = x
    for i, (w, b) in enumerate(zip(weights, biases)):
        h = h @ w + b
        if i < len(weights) - 1:
            h = jnp.maximum(h, 0.0)
    return h


if __name__ == "__main__":
    key = jax.random.PRNGKey(0)

    batch, seq = 2, 8
    input_dim, hidden_dim, output_dim, num_layers = 32, 64, 16, 3

    kx, kx2, kp = jax.random.split(key, 3)
    x = jax.random.normal(kx, (batch, seq, input_dim), dtype=jnp.float32)
    weights, biases = init_mlp_params(kp, input_dim, hidden_dim, output_dim,
                                      num_layers)

    out = mlp_forward(x, weights, biases)
    out = jax.block_until_ready(out)
    ref = mlp_reference(x, weights, biases)
    assert out.shape == (batch, seq, output_dim)
    assert jnp.allclose(out, ref, atol=1e-4, rtol=1e-4), "mismatch vs reference"

    # Non-multiple row count exercises the M-padding path (no divisibility assert).
    x2 = jax.random.normal(kx2, (3, 5, input_dim), dtype=jnp.float32)
    out2 = jax.block_until_ready(mlp_forward(x2, weights, biases))
    ref2 = mlp_reference(x2, weights, biases)
    assert out2.shape == (3, 5, output_dim)
    assert jnp.allclose(out2, ref2, atol=1e-4, rtol=1e-4), "mismatch vs reference (ragged M)"

    print("KERNEL_OK")
</pallas_src>

<mosaic_0001>
module attributes {stable_mosaic.version = 11 : i64} {
  func.func @_mlp_kernel(%arg0: i32, %arg1: memref<16x128xf32, #tpu.memory_space<vmem>>, %arg2: memref<128x128xf32, #tpu.memory_space<vmem>>, %arg3: memref<1x128xf32, #tpu.memory_space<vmem>>, %arg4: memref<128x128xf32, #tpu.memory_space<vmem>>, %arg5: memref<1x128xf32, #tpu.memory_space<vmem>>, %arg6: memref<128x128xf32, #tpu.memory_space<vmem>>, %arg7: memref<1x128xf32, #tpu.memory_space<vmem>>, %arg8: memref<16x128xf32, #tpu.memory_space<vmem>>) attributes {dimension_semantics = [#tpu.dimension_semantics<parallel>], iteration_bounds = array<i64: 1>, scalar_prefetch = 0 : i64, scratch_operands = 0 : i64, tpu.core_type = #tpu.core_type<tc>, window_params = [{transform_indices = @transform_0, window_bounds = array<i64: 16, 128>}, {pipeline_mode = #tpu.pipeline_mode<synchronous>, transform_indices = @transform_1, window_bounds = array<i64: 128, 128>}, {pipeline_mode = #tpu.pipeline_mode<synchronous>, transform_indices = @transform_2, window_bounds = array<i64: 1, 128>}, {pipeline_mode = #tpu.pipeline_mode<synchronous>, transform_indices = @transform_3, window_bounds = array<i64: 128, 128>}, {pipeline_mode = #tpu.pipeline_mode<synchronous>, transform_indices = @transform_4, window_bounds = array<i64: 1, 128>}, {pipeline_mode = #tpu.pipeline_mode<synchronous>, transform_indices = @transform_5, window_bounds = array<i64: 128, 128>}, {pipeline_mode = #tpu.pipeline_mode<synchronous>, transform_indices = @transform_6, window_bounds = array<i64: 1, 128>}, {transform_indices = @transform_7, window_bounds = array<i64: 16, 128>}]} {
    %c0 = arith.constant 0 : index
    %c0_0 = arith.constant 0 : index
    %0 = vector.load %arg1[%c0, %c0_0] : memref<16x128xf32, #tpu.memory_space<vmem>>, vector<16x128xf32>
    %c0_1 = arith.constant 0 : index
    %c0_2 = arith.constant 0 : index
    %1 = vector.load %arg2[%c0_1, %c0_2] : memref<128x128xf32, #tpu.memory_space<vmem>>, vector<128x128xf32>
    %c0_3 = arith.constant 0 : index
    %c0_4 = arith.constant 0 : index
    %2 = vector.load %arg3[%c0_3, %c0_4] : memref<1x128xf32, #tpu.memory_space<vmem>>, vector<1x128xf32>
    %cst = arith.constant dense<0.000000e+00> : vector<16x128xf32>
    %3 = tpu.matmul %0, %1, %cst {dimension_numbers = #tpu.dot_dimension_numbers<[1], [0], [0], [1], [0, 0, 1, 1], [], []>} : vector<16x128xf32>, vector<128x128xf32>, vector<16x128xf32> -> vector<16x128xf32>
    %4 = vector.broadcast %2 : vector<1x128xf32> to vector<16x128xf32>
    %5 = arith.addf %3, %4 : vector<16x128xf32>
    %cst_5 = arith.constant 0.000000e+00 : f32
    %6 = vector.broadcast %cst_5 : f32 to vector<16x128xf32>
    %7 = arith.maximumf %5, %6 : vector<16x128xf32>
    %c0_6 = arith.constant 0 : index
    %c0_7 = arith.constant 0 : index
    %8 = vector.load %arg4[%c0_6, %c0_7] : memref<128x128xf32, #tpu.memory_space<vmem>>, vector<128x128xf32>
    %c0_8 = arith.constant 0 : index
    %c0_9 = arith.constant 0 : index
    %9 = vector.load %arg5[%c0_8, %c0_9] : memref<1x128xf32, #tpu.memory_space<vmem>>, vector<1x128xf32>
    %cst_10 = arith.constant dense<0.000000e+00> : vector<16x128xf32>
    %10 = tpu.matmul %7, %8, %cst_10 {dimension_numbers = #tpu.dot_dimension_numbers<[1], [0], [0], [1], [0, 0, 1, 1], [], []>} : vector<16x128xf32>, vector<128x128xf32>, vector<16x128xf32> -> vector<16x128xf32>
    %11 = vector.broadcast %9 : vector<1x128xf32> to vector<16x128xf32>
    %12 = arith.addf %10, %11 : vector<16x128xf32>
    %cst_11 = arith.constant 0.000000e+00 : f32
    %13 = vector.broadcast %cst_11 : f32 to vector<16x128xf32>
    %14 = arith.maximumf %12, %13 : vector<16x128xf32>
    %c0_12 = arith.constant 0 : index
    %c0_13 = arith.constant 0 : index
    %15 = vector.load %arg6[%c0_12, %c0_13] : memref<128x128xf32, #tpu.memory_space<vmem>>, vector<128x128xf32>
    %c0_14 = arith.constant 0 : index
    %c0_15 = arith.constant 0 : index
    %16 = vector.load %arg7[%c0_14, %c0_15] : memref<1x128xf32, #tpu.memory_space<vmem>>, vector<1x128xf32>
    %cst_16 = arith.constant dense<0.000000e+00> : vector<16x128xf32>
    %17 = tpu.matmul %14, %15, %cst_16 {dimension_numbers = #tpu.dot_dimension_numbers<[1], [0], [0], [1], [0, 0, 1, 1], [], []>} : vector<16x128xf32>, vector<128x128xf32>, vector<16x128xf32> -> vector<16x128xf32>
    %18 = vector.broadcast %16 : vector<1x128xf32> to vector<16x128xf32>
    %19 = arith.addf %17, %18 : vector<16x128xf32>
    %c0_17 = arith.constant 0 : index
    %c0_18 = arith.constant 0 : index
    %20 = vector.load %arg8[%c0_17, %c0_18] : memref<16x128xf32, #tpu.memory_space<vmem>>, vector<16x128xf32>
    tpu.vector_store %arg8[%c0_17, %c0_18], %19 {strides = array<i32>} : memref<16x128xf32, #tpu.memory_space<vmem>>, vector<16x128xf32>,
    return
  }
  func.func @transform_0(%arg0: i32) -> (i32, i32) {
    %c0_i32 = arith.constant 0 : i32
    %c0_i32_0 = arith.constant 0 : i32
    return %arg0, %c0_i32 : i32, i32
  }
  func.func @transform_1(%arg0: i32) -> (i32, i32) {
    %c0_i32 = arith.constant 0 : i32
    %c0_i32_0 = arith.constant 0 : i32
    %c0_i32_1 = arith.constant 0 : i32
    return %c0_i32, %c0_i32_0 : i32, i32
  }
  func.func @transform_2(%arg0: i32) -> (i32, i32) {
    %c0_i32 = arith.constant 0 : i32
    %c0_i32_0 = arith.constant 0 : i32
    %c0_i32_1 = arith.constant 0 : i32
    return %c0_i32, %c0_i32_0 : i32, i32
  }
  func.func @transform_3(%arg0: i32) -> (i32, i32) {
    %c0_i32 = arith.constant 0 : i32
    %c0_i32_0 = arith.constant 0 : i32
    %c0_i32_1 = arith.constant 0 : i32
    return %c0_i32, %c0_i32_0 : i32, i32
  }
  func.func @transform_4(%arg0: i32) -> (i32, i32) {
    %c0_i32 = arith.constant 0 : i32
    %c0_i32_0 = arith.constant 0 : i32
    %c0_i32_1 = arith.constant 0 : i32
    return %c0_i32, %c0_i32_0 : i32, i32
  }
  func.func @transform_5(%arg0: i32) -> (i32, i32) {
    %c0_i32 = arith.constant 0 : i32
    %c0_i32_0 = arith.constant 0 : i32
    %c0_i32_1 = arith.constant 0 : i32
    return %c0_i32, %c0_i32_0 : i32, i32
  }
  func.func @transform_6(%arg0: i32) -> (i32, i32) {
    %c0_i32 = arith.constant 0 : i32
    %c0_i32_0 = arith.constant 0 : i32
    %c0_i32_1 = arith.constant 0 : i32
    return %c0_i32, %c0_i32_0 : i32, i32
  }
  func.func @transform_7(%arg0: i32) -> (i32, i32) {
    %c0_i32 = arith.constant 0 : i32
    %c0_i32_0 = arith.constant 0 : i32
    return %arg0, %c0_i32 : i32, i32
  }
}

</mosaic_0001>

<bundles_post_ra>
// kernel: tpu_custom_call.1
= control target key start
LH: loop header
LB: loop body
LE: loop exit
PB: predicated region body
PF: predicated region fallthrough
CT: control target
= control target key end

     0   :  { %12 = vsyncpa [#allocation3], 0  ;;  %s488_s0 = inlined_call_operand.hbm [shape: f32[16,128], index: 0, kind: input, shape index: {}]   ;;  %s489_s1 = inlined_call_operand.hbm [shape: f32[128,128], index: 1, kind: input, shape index: {}]   ;;  %s490_s2 = inlined_call_operand.vmem [shape: f32[1,128], index: 2, kind: input, shape index: {}]   ;;  %s491_s3 = inlined_call_operand.hbm [shape: f32[128,128], index: 3, kind: input, shape index: {}]   ;;  %s492_s4 = inlined_call_operand.vmem [shape: f32[1,128], index: 4, kind: input, shape index: {}]   ;;  %s493_s5 = inlined_call_operand.hbm [shape: f32[128,128], index: 5, kind: input, shape index: {}]   ;;  %s494_s6 = inlined_call_operand.vmem [shape: f32[1,128], index: 6, kind: input, shape index: {}]   ;;  %s495_s7 = inlined_call_operand.hbm [shape: f32[16,128], index: 7, kind: output, shape index: {}]  }
   0x1   :  { %13 = vsyncpa [#allocation6], 0 }
   0x2   :  { %14 = vsyncpa [#allocation9], 0 }
   0x3   :  { %15 = vsyncpa [#allocation4], 0  ;;  %s33_s26 = sshll.u32 %s489_s1, 4  ;;  %s402_s27 = smov [#allocation5]   ;;  %s34_s26 = int_to_ptr.hbm [resolvable:$true] %s33_s26 }
   0x4   :  { %s35_s28 = sshll.u32 %s402_s27, 4  ;;  %s20_s8 = sshll.u32 %s488_s0, 4  ;;  %s36_s28 = int_to_ptr.vmem [resolvable:$true] %s35_s28  ;;  %s21_s8 = int_to_ptr.hbm [resolvable:$true] %s20_s8 }
   0x5   :  { %s403_s9 = smov 128   ;;  %s404_s10 = smov 8  }
   0x6   :  { %41 = dma.hbm_to_vmem [thread:$0]  %s34_s26, 2048, %s36_s28, [#allocation6], %s403_s9, %s403_s9, %s404_s10  }
   0x7   :  { %s405_s11 = smov [#allocation2]   ;;  %s48_s1 = sshll.u32 %s491_s3, 4  ;;  %s49_s1 = int_to_ptr.hbm [resolvable:$true] %s48_s1 }
   0x8   :  { %s22_s12 = sshll.u32 %s405_s11, 4  ;;  %s63_s16 = sshll.u32 %s493_s5, 4  ;;  %s23_s12 = int_to_ptr.vmem [resolvable:$true] %s22_s12  ;;  %s64_s16 = int_to_ptr.hbm [resolvable:$true] %s63_s16 }
   0x9   :  { %28 = dma.hbm_to_vmem [thread:$0]  %s21_s8, 256, %s23_s12, [#allocation3], %s403_s9, %s403_s9, %s404_s10  }
   0xa   :  { %s406_s17 = smov [#allocation7]   ;;  %s407_s19 = smov [#allocation8]  }
   0xb   :  { %s50_s18 = sshll.u32 %s406_s17, 4  ;;  %s65_s3 = sshll.u32 %s407_s19, 4  ;;  %s51_s18 = int_to_ptr.vmem [resolvable:$true] %s50_s18  ;;  %s66_s3 = int_to_ptr.vmem [resolvable:$true] %s65_s3 }
   0xc   :  { %56 = dma.hbm_to_vmem [thread:$0]  %s49_s1, 2048, %s51_s18, [#allocation6], %s403_s9, %s403_s9, %s404_s10  }
   0xd   :  { %71 = dma.hbm_to_vmem [thread:$0]  %s64_s16, 2048, %s66_s3, [#allocation9], %s403_s9, %s403_s9, %s404_s10  }
   0xe   :  { %394 = dma.done.wait [#allocation3], 256  }
   0xf   :  { %395 = vsyncadd [#allocation3], 4294967040 }
  0x10   :  { %396 = dma.done.wait [#allocation6], 4096  }
  0x11   :  { %397 = vsyncadd [#allocation6], 4294963200 }
  0x12   :  { %398 = dma.done.wait [#allocation9], 2048  }
  0x13   :  { %399 = vsyncadd [#allocation9], 4294965248  ;;  %v107_v0 = vld [vmem:[#allocation5 + $0x78] sm:$0xff]  ;;  %v106_v1 = vld [vmem:[#allocation5 + $0x70] sm:$0xff]  ;;  %s408_s24 = smov [#allocation10]  }
  0x14   :  { %112 = vmatpush.msra.mxu0 %v107_v0  ;;  %248 = vmatpush.msra.mxu3 %v107_v0  ;;  %v105_v2 = vld [vmem:[#allocation5 + $0x68] sm:$0xff]  ;;  %v104_v3 = vld [vmem:[#allocation5 + $0x60] sm:$0xff]  ;;  %v103_v4 = vld [vmem:[#allocation5 + $0x58] sm:$0xff]  ;;  %s231_s25 = sshll.u32 %s408_s24, 4  ;;  %s232_s25 = int_to_ptr.vmem [resolvable:$true] %s231_s25 }
  0x15   :  { %v152_v5 = vld [vmem:[#allocation7 + $0x78] sm:$0xff]  ;;  %v151_v6 = vld [vmem:[#allocation7 + $0x70] sm:$0xff]  ;;  %v150_v8 = vld [vmem:[#allocation7 + $0x68] sm:$0xff] }
  0x16   :  { %113 = vmatpush.msra.mxu0 %v106_v1  ;;  %249 = vmatpush.msra.mxu3 %v106_v1  ;;  %v102_v7 = vld [vmem:[#allocation5 + $0x50] sm:$0xff]  ;;  %v101_v9 = vld [vmem:[#allocation5 + $0x48] sm:$0xff]  ;;  %v149_v10 = vld [vmem:[#allocation7 + $0x60] sm:$0xff] }
  0x17   :  { %157 = vmatpush.msra.mxu1 %v152_v5  ;;  %v100_v11 = vld [vmem:[#allocation5 + $0x40] sm:$0xff]  ;;  %v148_v12 = vld [vmem:[#allocation7 + $0x58] sm:$0xff]  ;;  %v147_v14 = vld [vmem:[#allocation7 + $0x50] sm:$0xff] }
  0x18   :  { %114 = vmatpush.msra.mxu0 %v105_v2  ;;  %250 = vmatpush.msra.mxu3 %v105_v2  ;;  %v99_v13 = vld [vmem:[#allocation5 + $0x38] sm:$0xff]  ;;  %v98_v15 = vld [vmem:[#allocation5 + $0x30] sm:$0xff]  ;;  %v146_v16 = vld [vmem:[#allocation7 + $0x48] sm:$0xff] }
  0x19   :  { %158 = vmatpush.msra.mxu1 %v151_v6  ;;  %v97_v17 = vld [vmem:[#allocation5 + $0x28] sm:$0xff]  ;;  %v145_v18 = vld [vmem:[#allocation7 + $0x40] sm:$0xff]  ;;  %v144_v20 = vld [vmem:[#allocation7 + $0x38] sm:$0xff] }
  0x1a   :  { %115 = vmatpush.msra.mxu0 %v104_v3  ;;  %251 = vmatpush.msra.mxu3 %v104_v3  ;;  %v96_v19 = vld [vmem:[#allocation5 + $0x20] sm:$0xff]  ;;  %v95_v21 = vld [vmem:[#allocation5 + $0x18] sm:$0xff]  ;;  %v143_v22 = vld [vmem:[#allocation7 + $0x30] sm:$0xff] }
  0x1b   :  { %159 = vmatpush.msra.mxu1 %v150_v8  ;;  %v94_v23 = vld [vmem:[#allocation5 + $0x10] sm:$0xff]  ;;  %v142_v24 = vld [vmem:[#allocation7 + $0x28] sm:$0xff]  ;;  %v141_v26 = vld [vmem:[#allocation7 + $0x20] sm:$0xff] }
  0x1c   :  { %116 = vmatpush.msra.mxu0 %v103_v4  ;;  %252 = vmatpush.msra.mxu3 %v103_v4  ;;  %v93_v25 = vld [vmem:[#allocation5 + $0x8] sm:$0xff]  ;;  %v92_v27 = vld [vmem:[#allocation5] sm:$0xff]  ;;  %v90_v28 = vld [vmem:[#allocation2] sm:$0xff] }
  0x1d   :  { %160 = vmatpush.msra.mxu1 %v149_v10  ;;  %v91_v29 = vld [vmem:[#allocation2 + $0x8] sm:$0xff]  ;;  %v139_v31 = vld [vmem:[#allocation7 + $0x10] sm:$0xff]  ;;  %v138_v32 = vld [vmem:[#allocation7 + $0x8] sm:$0xff] }
  0x1e   :  { %117 = vmatpush.msra.mxu0 %v102_v7  ;;  %253 = vmatpush.msra.mxu3 %v102_v7  ;;  %v140_v30 = vld [vmem:[#allocation7 + $0x18] sm:$0xff]  ;;  %v137_v33 = vld [vmem:[#allocation7] sm:$0xff]  ;;  %v196_v35 = vld [vmem:[#allocation8 + $0x70] sm:$0xff] }
  0x1f   :  { %161 = vmatpush.msra.mxu1 %v148_v12  ;;  %v197_v34 = vld [vmem:[#allocation8 + $0x78] sm:$0xff]  ;;  %v195_v36 = vld [vmem:[#allocation8 + $0x68] sm:$0xff]  ;;  %v194_v37 = vld [vmem:[#allocation8 + $0x60] sm:$0xff] }
  0x20   :  { %118 = vmatpush.msra.mxu0 %v101_v9  ;;  %254 = vmatpush.msra.mxu3 %v101_v9  ;;  %v193_v38 = vld [vmem:[#allocation8 + $0x58] sm:$0xff]  ;;  %v192_v39 = vld [vmem:[#allocation8 + $0x50] sm:$0xff]  ;;  %v191_v40 = vld [vmem:[#allocation8 + $0x48] sm:$0xff] }
  0x21   :  { %162 = vmatpush.msra.mxu1 %v147_v14  ;;  %202 = vmatpush.msra.mxu2 %v197_v34  ;;  %v190_v41 = vld [vmem:[#allocation8 + $0x40] sm:$0xff]  ;;  %v189_v42 = vld [vmem:[#allocation8 + $0x38] sm:$0xff]  ;;  %v271_v43 = vld [vmem:[%s490_s2] ss:$0 sm:$0xff] }
  0x22   :  { %119 = vmatpush.msra.mxu0 %v100_v11  ;;  %255 = vmatpush.msra.mxu3 %v100_v11  ;;  %v188_v44 = vld [vmem:[#allocation8 + $0x30] sm:$0xff]  ;;  %v187_v45 = vld [vmem:[#allocation8 + $0x28] sm:$0xff]  ;;  %v186_v48 = vld [vmem:[#allocation8 + $0x20] sm:$0xff] }
  0x23   :  { %163 = vmatpush.msra.mxu1 %v146_v16  ;;  %203 = vmatpush.msra.mxu2 %v196_v35  ;;  %v185_v50 = vld [vmem:[#allocation8 + $0x18] sm:$0xff]  ;;  %v184_v54 = vld [vmem:[#allocation8 + $0x10] sm:$0xff]  ;;  %v183_v55 = vld [vmem:[#allocation8 + $0x8] sm:$0xff] }
  0x24   :  { %120 = vmatpush.msra.mxu0 %v99_v13  ;;  %256 = vmatpush.msra.mxu3 %v99_v13  ;;  %v182_v56 = vld [vmem:[#allocation8] sm:$0xff]  ;;  %v272_v57 = vld [vmem:[%s492_s4] ss:$0 sm:$0xff]  ;;  %s233_s4 = sshll.u32 %s495_s7, 4  ;;  %s234_s4 = int_to_ptr.hbm [resolvable:$true] %s233_s4 }
  0x25   :  { %164 = vmatpush.msra.mxu1 %v145_v18  ;;  %204 = vmatpush.msra.mxu2 %v195_v36  ;;  %v273_v0 = vld [vmem:[%s494_s6] ss:$0 sm:$0xff] }
  0x26   :  { %121 = vmatpush.msra.mxu0 %v98_v15  ;;  %257 = vmatpush.msra.mxu3 %v98_v15 }
  0x27   :  { %165 = vmatpush.msra.mxu1 %v144_v20  ;;  %205 = vmatpush.msra.mxu2 %v194_v37 }
  0x28   :  { %122 = vmatpush.msra.mxu0 %v97_v17  ;;  %258 = vmatpush.msra.mxu3 %v97_v17 }
  0x29   :  { %166 = vmatpush.msra.mxu1 %v143_v22  ;;  %206 = vmatpush.msra.mxu2 %v193_v38 }
  0x2a   :  { %123 = vmatpush.msra.mxu0 %v96_v19  ;;  %259 = vmatpush.msra.mxu3 %v96_v19 }
  0x2b   :  { %167 = vmatpush.msra.mxu1 %v142_v24  ;;  %207 = vmatpush.msra.mxu2 %v192_v39 }
  0x2c   :  { %124 = vmatpush.msra.mxu0 %v95_v21  ;;  %260 = vmatpush.msra.mxu3 %v95_v21 }
  0x2d   :  { %168 = vmatpush.msra.mxu1 %v141_v26  ;;  %208 = vmatpush.msra.mxu2 %v191_v40 }
  0x2e   :  { %125 = vmatpush.msra.mxu0 %v94_v23  ;;  %261 = vmatpush.msra.mxu3 %v94_v23 }
  0x2f   :  { %169 = vmatpush.msra.mxu1 %v140_v30  ;;  %209 = vmatpush.msra.mxu2 %v190_v41 }
  0x30   :  { %126 = vmatpush.msra.mxu0 %v93_v25  ;;  %262 = vmatpush.msra.mxu3 %v93_v25 }
  0x31   :  { %170 = vmatpush.msra.mxu1 %v139_v31  ;;  %210 = vmatpush.msra.mxu2 %v189_v42 }
  0x32   :  { %127 = vmatpush.msra.mxu0 %v92_v27  ;;  %263 = vmatpush.msra.mxu3 %v92_v27 }
  0x33   :  { %128 = vmatmul.f32.vlgmr.msra.gmra.mxu0 %v90_v28  ;;  %131 = vmatmul.f32.vlgmr.msra.gmra.mxu3 %v91_v29 }
  0x34   :  { %171 = vmatpush.msra.mxu1 %v138_v32  ;;  %211 = vmatpush.msra.mxu2 %v188_v44 }
  0x36   :  { %172 = vmatpush.msra.mxu1 %v137_v33  ;;  %212 = vmatpush.msra.mxu2 %v187_v45 }
  0x38   :  { %213 = vmatpush.msra.mxu2 %v186_v48 }
  0x3a   :  { %214 = vmatpush.msra.mxu2 %v185_v50 }
  0x3c   :  { %215 = vmatpush.msra.mxu2 %v184_v54 }
  0x3e   :  { %216 = vmatpush.msra.mxu2 %v183_v55 }
  0x40   :  { %217 = vmatpush.msra.mxu2 %v182_v56 }
  0xb0   :  { %v129_v46 = vpop.f32.mrf.mxu0 }
  0xb1   :  { %v130_v47 = vadd.f32 %v271_v43, %v129_v46 }
  0xb3   :  { %v135_v49 = vmax.f32 %v130_v47, 0.0 }
  0xb5   :  { %173 = vmatmul.f32.vlgmr.msra.gmra.mxu1 %v135_v49 }
  0xb6   :  { %v132_v51 = vpop.f32.mrf.mxu3 }
  0xb7   :  { %v133_v52 = vadd.f32 %v271_v43, %v132_v51 }
  0xb9   :  { %v136_v53 = vmax.f32 %v133_v52, 0.0 }
  0xbd   :  { %176 = vmatmul.f32.gmra.mxu1 %v136_v53 }
 0x132   :  { %v174_v58 = vpop.f32.mrf.mxu1 }
 0x133   :  { %v175_v59 = vadd.f32 %v272_v57, %v174_v58 }
 0x135   :  { %v180_v60 = vmax.f32 %v175_v59, 0.0 }
 0x137   :  { %218 = vmatmul.f32.vlgmr.msra.gmra.mxu2 %v180_v60 }
 0x13a   :  { %v177_v61 = vpop.f32.mrf.mxu1 }
 0x13b   :  { %v178_v62 = vadd.f32 %v272_v57, %v177_v61 }
 0x13d   :  { %v181_v63 = vmax.f32 %v178_v62, 0.0 }
 0x13f   :  { %221 = vmatmul.f32.gmra.mxu2 %v181_v63 }
 0x1ba   :  { %v219_v1 = vpop.f32.mrf.mxu2 }
 0x1bb   :  { %v220_v2 = vadd.f32 %v273_v0, %v219_v1 }
 0x1bd   :  { %225 = vst [vmem:[#allocation10] sm:$0xff] %v220_v2 }
 0x1c2   :  { %v222_v3 = vpop.f32.mrf.mxu2 }
 0x1c3   :  { %v223_v4 = vadd.f32 %v273_v0, %v222_v3 }
 0x1c5   :  { %226 = vst [vmem:[#allocation10 + $0x8] sm:$0xff] %v223_v4 }
 0x1c6   :  { %239 = dma.vmem_to_hbm [thread:$0]  %s232_s25, 256, %s234_s4, [#allocation4], %s403_s9, %s403_s9, %s404_s10  }
 0x1c7   :  { %400 = dma.done.wait [#allocation4], 256  }
 0x1c8   :  { %401 = vsyncadd [#allocation4], 4294967040 }
 0x1c9   :  { %244 = vsyncpa [#allocation3], 1 }
 0x1ca   :  { %245 = vsyncpa [#allocation6], 1 }
 0x1cb   :  { %246 = vsyncpa [#allocation9], 1 }
 0x1cc   :  { %247 = vsyncpa [#allocation4], 1 }

</bundles_post_ra>
